<compile_context>
chip_gen: v5e
topology: v5e:2x2
jax: 0.10.0
libtpu: 0.0.40
codegen_flags: <defaults>
</compile_context>

<pallas_src>
import numpy as np
import jax
import jax.numpy as jnp
from jax.experimental import pallas as pl
from jax.experimental.pallas import tpu as pltpu


def _round_up(x, m):
    return ((x + m - 1) // m) * m


def _cdiv(a, b):
    return -(-a // b)


def _pad8(c):
    return _round_up(c, 8)


# ----------------------------------------------------------------------------
# VPU kernel (small channel counts — the outconv case).
#   w_ref: (Cout, Cin)  SMEM (scalar weights)
#   b_ref: (Cout,)      SMEM
#   x_ref: (Nb, Cin, ts) VMEM, lane-dense spatial tile
#   o_ref: (Nb, Cout, ts) VMEM
# ----------------------------------------------------------------------------
def _make_vpu_conv1x1_kernel(cin, cout):
    def kernel(w_ref, b_ref, x_ref, o_ref):
        xs = [x_ref[:, c, :] for c in range(cin)]          # (Nb, ts) each
        for o in range(cout):
            acc = xs[0] * w_ref[o, 0]
            for c in range(1, cin):
                acc = acc + xs[c] * w_ref[o, c]
            o_ref[:, o, :] = acc + b_ref[o]
    return kernel


# ----------------------------------------------------------------------------
# MXU fallback (large channel counts): y = W(Cout,Cin) @ x(Cin, ts) + b.
# ----------------------------------------------------------------------------
def _mxu_conv1x1_kernel(w_ref, b_ref, x_ref, o_ref):
    nb = x_ref.shape[0]
    for n in range(nb):
        y = jnp.dot(w_ref[...], x_ref[n],
                    preferred_element_type=jnp.float32)     # (Cout, ts)
        o_ref[n] = (y + b_ref[...]).astype(o_ref.dtype)


def outconv_forward_nchw(x, w, b, *,
                         vmem_data_budget=32 * 1024 * 1024,
                         vmem_limit_bytes=48 * 1024 * 1024):
    """1x1 conv, NCHW in / NCHW out, f32.

    x: (N, Cin, H, W), w: (Cout, Cin, 1, 1) (PyTorch layout), b: (Cout,)
    """
    N, Cin, H, W = x.shape
    Cout = w.shape[0]
    HW = H * W
    LANE = 128

    HW128 = _round_up(HW, LANE)

    # VMEM cost per spatial column: input + output blocks, sublane-padded to 8
    # rows each, f32, double-buffered by the pipeline.
    bytes_per_col = (_pad8(Cin) + _pad8(Cout)) * 4 * 2
    max_cols = max(LANE, (vmem_data_budget // bytes_per_col) // LANE * LANE)

    if HW128 <= max_cols:
        # Whole image fits in one spatial tile; pack as many batch elements
        # per step as the budget allows (fewer grid steps -> less fixed
        # per-step overhead on small feature maps).
        ts = HW128
        n_tiles = 1
        nb = 1
        for cand in range(N, 0, -1):
            if N % cand == 0 and cand * HW128 <= max_cols:
                nb = cand
                break
    else:
        # Split HW128 evenly over the minimum number of tiles that fit the
        # budget (instead of padding HW up to a multiple of a fixed tile).
        nb = 1
        n_tiles = _cdiv(HW128, max_cols)
        ts = _round_up(_cdiv(HW128, n_tiles), LANE)

    HWp = n_tiles * ts
    xf = x.reshape(N, Cin, HW)
    if HWp != HW:
        xf = jnp.pad(xf, ((0, 0), (0, 0), (0, HWp - HW)))

    grid = (n_tiles, N // nb)   # large (spatial) axis leads for megacore/v7x

    x_spec = pl.BlockSpec((nb, Cin, ts), lambda s, n: (n, 0, s))
    o_spec = pl.BlockSpec((nb, Cout, ts), lambda s, n: (n, 0, s))

    use_vpu = (Cin * Cout) <= 64
    if use_vpu:
        kernel = _make_vpu_conv1x1_kernel(Cin, Cout)
        w_arg = w.reshape(Cout, Cin)
        b_arg = b.reshape(Cout)
        w_spec = pl.BlockSpec(memory_space=pltpu.MemorySpace.SMEM)
        b_spec = pl.BlockSpec(memory_space=pltpu.MemorySpace.SMEM)
    else:
        kernel = _mxu_conv1x1_kernel
        w_arg = w.reshape(Cout, Cin)
        b_arg = b.reshape(Cout, 1)
        w_spec = pl.BlockSpec((Cout, Cin), lambda s, n: (0, 0))
        b_spec = pl.BlockSpec((Cout, 1), lambda s, n: (0, 0))

    cost = pl.CostEstimate(
        flops=2 * N * HWp * Cin * Cout,
        transcendentals=0,
        bytes_accessed=4 * (N * Cin * HWp + Cout * Cin + Cout + N * Cout * HWp),
    )

    out = pl.pallas_call(
        kernel,
        out_shape=jax.ShapeDtypeStruct((N, Cout, HWp), jnp.float32),
        grid=grid,
        in_specs=[w_spec, b_spec, x_spec],
        out_specs=o_spec,
        compiler_params=pltpu.CompilerParams(
            dimension_semantics=("parallel", "parallel"),
            vmem_limit_bytes=vmem_limit_bytes),
        cost_estimate=cost,
    )(w_arg, b_arg, xf)

    if HWp != HW:
        out = out[:, :, :HW]
    return out.reshape(N, Cout, H, W)


# ----------------------------------------------------------------------------
# Parameter init matching nn.Conv2d(in_ch, out_ch, 1) default bounds.
# ----------------------------------------------------------------------------
def init_outconv_params(key, in_ch, out_ch):
    kw, kb = jax.random.split(key)
    fan_in = in_ch * 1 * 1
    bound = 1.0 / np.sqrt(fan_in)
    w = jax.random.uniform(kw, (out_ch, in_ch, 1, 1), jnp.float32, -bound, bound)
    b = jax.random.uniform(kb, (out_ch,), jnp.float32, -bound, bound)
    return {"w": w, "b": b}


if __name__ == "__main__":
    # Small shapes consistent with the module: outconv(in_ch=4, out_ch=2)
    N, in_ch, out_ch = 2, 4, 2
    H, W = 16, 16

    key = jax.random.PRNGKey(0)
    kx, kp = jax.random.split(key)
    x = jax.random.normal(kx, (N, in_ch, H, W), jnp.float32)
    params = init_outconv_params(kp, in_ch, out_ch)

    out = outconv_forward_nchw(x, params["w"], params["b"])
    out = jax.block_until_ready(out)

    # Reference: plain XLA 1x1 conv (channel contraction + bias), f32.
    ref = jnp.einsum("nchw,oc->nohw", x, params["w"].reshape(out_ch, in_ch))
    ref = ref + params["b"].reshape(1, out_ch, 1, 1)

    assert out.shape == (N, out_ch, H, W), out.shape
    assert bool(jnp.all(jnp.isfinite(out)))
    np.testing.assert_allclose(np.asarray(out), np.asarray(ref),
                               rtol=1e-5, atol=1e-5)
    # TODO(synk): the PyTorch forward's host-side print('outconv finished') is
    # intentionally omitted (no in-kernel equivalent needed for semantics).
    print("KERNEL_OK")
</pallas_src>

<mosaic_0001>
module attributes {stable_mosaic.version = 11 : i64} {
  func.func @kernel(%arg0: i32, %arg1: i32, %arg2: memref<2x4xf32, #tpu.memory_space<smem>>, %arg3: memref<2xf32, #tpu.memory_space<smem>>, %arg4: memref<2x4x256xf32, #tpu.memory_space<vmem>>, %arg5: memref<2x2x256xf32, #tpu.memory_space<vmem>>) attributes {dimension_semantics = [#tpu.dimension_semantics<parallel>, #tpu.dimension_semantics<parallel>], iteration_bounds = array<i64: 1, 1>, scalar_prefetch = 0 : i64, scratch_operands = 0 : i64, tpu.core_type = #tpu.core_type<tc>, window_params = [{transform_indices = @transform_0, window_bounds = array<i64: 2, 4>}, {transform_indices = @transform_1, window_bounds = array<i64: 2>}, {transform_indices = @transform_2, window_bounds = array<i64: 2, 4, 256>}, {transform_indices = @transform_3, window_bounds = array<i64: 2, 2, 256>}]} {
    %c0 = arith.constant 0 : index
    %c0_0 = arith.constant 0 : index
    %c0_1 = arith.constant 0 : index
    %0 = vector.load %arg4[%c0, %c0_0, %c0_1] : memref<2x4x256xf32, #tpu.memory_space<vmem>>, vector<2x1x256xf32>
    %1 = vector.shape_cast %0 : vector<2x1x256xf32> to vector<2x256xf32>
    %c0_2 = arith.constant 0 : index
    %c1 = arith.constant 1 : index
    %c0_3 = arith.constant 0 : index
    %2 = vector.load %arg4[%c0_2, %c1, %c0_3] : memref<2x4x256xf32, #tpu.memory_space<vmem>>, vector<2x1x256xf32>
    %3 = vector.shape_cast %2 : vector<2x1x256xf32> to vector<2x256xf32>
    %c0_4 = arith.constant 0 : index
    %c2 = arith.constant 2 : index
    %c0_5 = arith.constant 0 : index
    %4 = vector.load %arg4[%c0_4, %c2, %c0_5] : memref<2x4x256xf32, #tpu.memory_space<vmem>>, vector<2x1x256xf32>
    %5 = vector.shape_cast %4 : vector<2x1x256xf32> to vector<2x256xf32>
    %c0_6 = arith.constant 0 : index
    %c3 = arith.constant 3 : index
    %c0_7 = arith.constant 0 : index
    %6 = vector.load %arg4[%c0_6, %c3, %c0_7] : memref<2x4x256xf32, #tpu.memory_space<vmem>>, vector<2x1x256xf32>
    %7 = vector.shape_cast %6 : vector<2x1x256xf32> to vector<2x256xf32>
    %c0_8 = arith.constant 0 : index
    %c0_9 = arith.constant 0 : index
    %8 = memref.load %arg2[%c0_8, %c0_9] : memref<2x4xf32, #tpu.memory_space<smem>>
    %9 = vector.broadcast %8 : f32 to vector<2x256xf32>
    %10 = arith.mulf %1, %9 : vector<2x256xf32>
    %c0_10 = arith.constant 0 : index
    %c1_11 = arith.constant 1 : index
    %11 = memref.load %arg2[%c0_10, %c1_11] : memref<2x4xf32, #tpu.memory_space<smem>>
    %12 = vector.broadcast %11 : f32 to vector<2x256xf32>
    %13 = arith.mulf %3, %12 : vector<2x256xf32>
    %14 = arith.addf %10, %13 : vector<2x256xf32>
    %c0_12 = arith.constant 0 : index
    %c2_13 = arith.constant 2 : index
    %15 = memref.load %arg2[%c0_12, %c2_13] : memref<2x4xf32, #tpu.memory_space<smem>>
    %16 = vector.broadcast %15 : f32 to vector<2x256xf32>
    %17 = arith.mulf %5, %16 : vector<2x256xf32>
    %18 = arith.addf %14, %17 : vector<2x256xf32>
    %c0_14 = arith.constant 0 : index
    %c3_15 = arith.constant 3 : index
    %19 = memref.load %arg2[%c0_14, %c3_15] : memref<2x4xf32, #tpu.memory_space<smem>>
    %20 = vector.broadcast %19 : f32 to vector<2x256xf32>
    %21 = arith.mulf %7, %20 : vector<2x256xf32>
    %22 = arith.addf %18, %21 : vector<2x256xf32>
    %c0_16 = arith.constant 0 : index
    %23 = memref.load %arg3[%c0_16] : memref<2xf32, #tpu.memory_space<smem>>
    %24 = vector.broadcast %23 : f32 to vector<2x256xf32>
    %25 = arith.addf %22, %24 : vector<2x256xf32>
    %c0_17 = arith.constant 0 : index
    %c0_18 = arith.constant 0 : index
    %c0_19 = arith.constant 0 : index
    %26 = vector.load %arg5[%c0_17, %c0_18, %c0_19] : memref<2x2x256xf32, #tpu.memory_space<vmem>>, vector<2x1x256xf32>
    %27 = vector.shape_cast %26 : vector<2x1x256xf32> to vector<2x256xf32>
    %28 = vector.shape_cast %25 : vector<2x256xf32> to vector<2x1x256xf32>
    tpu.vector_store %arg5[%c0_17, %c0_18, %c0_19], %28 {strides = array<i32>} : memref<2x2x256xf32, #tpu.memory_space<vmem>>, vector<2x1x256xf32>,
    %c1_20 = arith.constant 1 : index
    %c0_21 = arith.constant 0 : index
    %29 = memref.load %arg2[%c1_20, %c0_21] : memref<2x4xf32, #tpu.memory_space<smem>>
    %30 = vector.broadcast %29 : f32 to vector<2x256xf32>
    %31 = arith.mulf %1, %30 : vector<2x256xf32>
    %c1_22 = arith.constant 1 : index
    %c1_23 = arith.constant 1 : index
    %32 = memref.load %arg2[%c1_22, %c1_23] : memref<2x4xf32, #tpu.memory_space<smem>>
    %33 = vector.broadcast %32 : f32 to vector<2x256xf32>
    %34 = arith.mulf %3, %33 : vector<2x256xf32>
    %35 = arith.addf %31, %34 : vector<2x256xf32>
    %c1_24 = arith.constant 1 : index
    %c2_25 = arith.constant 2 : index
    %36 = memref.load %arg2[%c1_24, %c2_25] : memref<2x4xf32, #tpu.memory_space<smem>>
    %37 = vector.broadcast %36 : f32 to vector<2x256xf32>
    %38 = arith.mulf %5, %37 : vector<2x256xf32>
    %39 = arith.addf %35, %38 : vector<2x256xf32>
    %c1_26 = arith.constant 1 : index
    %c3_27 = arith.constant 3 : index
    %40 = memref.load %arg2[%c1_26, %c3_27] : memref<2x4xf32, #tpu.memory_space<smem>>
    %41 = vector.broadcast %40 : f32 to vector<2x256xf32>
    %42 = arith.mulf %7, %41 : vector<2x256xf32>
    %43 = arith.addf %39, %42 : vector<2x256xf32>
    %c1_28 = arith.constant 1 : index
    %44 = memref.load %arg3[%c1_28] : memref<2xf32, #tpu.memory_space<smem>>
    %45 = vector.broadcast %44 : f32 to vector<2x256xf32>
    %46 = arith.addf %43, %45 : vector<2x256xf32>
    %c0_29 = arith.constant 0 : index
    %c1_30 = arith.constant 1 : index
    %c0_31 = arith.constant 0 : index
    %47 = vector.load %arg5[%c0_29, %c1_30, %c0_31] : memref<2x2x256xf32, #tpu.memory_space<vmem>>, vector<2x1x256xf32>
    %48 = vector.shape_cast %47 : vector<2x1x256xf32> to vector<2x256xf32>
    %49 = vector.shape_cast %46 : vector<2x256xf32> to vector<2x1x256xf32>
    tpu.vector_store %arg5[%c0_29, %c1_30, %c0_31], %49 {strides = array<i32>} : memref<2x2x256xf32, #tpu.memory_space<vmem>>, vector<2x1x256xf32>,
    return
  }
  func.func @transform_0(%arg0: i32, %arg1: i32) -> (i32, i32) {
    %c0_i32 = arith.constant 0 : i32
    %c0_i32_0 = arith.constant 0 : i32
    %c0_i32_1 = arith.constant 0 : i32
    return %c0_i32, %c0_i32_0 : i32, i32
  }
  func.func @transform_1(%arg0: i32, %arg1: i32) -> i32 {
    %c0_i32 = arith.constant 0 : i32
    %c0_i32_0 = arith.constant 0 : i32
    return %c0_i32 : i32
  }
  func.func @transform_2(%arg0: i32, %arg1: i32) -> (i32, i32, i32) {
    %c0_i32 = arith.constant 0 : i32
    %c0_i32_0 = arith.constant 0 : i32
    return %arg1, %c0_i32, %arg0 : i32, i32, i32
  }
  func.func @transform_3(%arg0: i32, %arg1: i32) -> (i32, i32, i32) {
    %c0_i32 = arith.constant 0 : i32
    %c0_i32_0 = arith.constant 0 : i32
    return %arg1, %c0_i32, %arg0 : i32, i32, i32
  }
}

</mosaic_0001>

<bundles_post_ra>
// kernel: tpu_custom_call.1
= control target key start
LH: loop header
LB: loop body
LE: loop exit
PB: predicated region body
PF: predicated region fallthrough
CT: control target
= control target key end

     0   :  { %8 = vsyncpa [#allocation5], 0  ;;  %s318_s0 = inlined_call_operand.hbm [shape: f32[2,4], index: 0, kind: input, shape index: {}]   ;;  %s319_s1 = inlined_call_operand.hbm [shape: f32[2], index: 1, kind: input, shape index: {}]   ;;  %s320_s2 = inlined_call_operand.hbm [shape: f32[2,4,256], index: 2, kind: input, shape index: {}]   ;;  %s321_s3 = inlined_call_operand.hbm [shape: f32[2,2,256], index: 3, kind: output, shape index: {}]  }
   0x1   :  { %9 = vsyncpa [#allocation7], 0 }
   0x2   :  { %10 = vsyncpa [#allocation3], 0 }
   0x3   :  { %11 = vsyncpa [#allocation4], 0  ;;  %s17_s14 = sshll.u32 %s318_s0, 4  ;;  %s26_s17 = sshll.u32 %s319_s1, 4  ;;  %s18_s14 = int_to_ptr.hbm [resolvable:$true] %s17_s14  ;;  %s27_s17 = int_to_ptr.hbm [resolvable:$true] %s26_s17 }
   0x4   :  { %s251_s18 = smov [#allocation2]   ;;  %s252_s19 = smov [#allocation6]  }
   0x5   :  { %20 = dma.hbm_to_smem %s18_s14, 32, %s251_s18, [#allocation5]  }
   0x6   :  { %29 = dma.hbm_to_smem %s27_s17, 16, %s252_s19, [#allocation7]  }
   0x7   :  { %s34_s22 = sshll.u32 %s320_s2, 4  ;;  %s253_s23 = smov [#allocation8]   ;;  %s35_s22 = int_to_ptr.hbm [resolvable:$true] %s34_s22 }
   0x8   :  { %s36_s24 = sshll.u32 %s253_s23, 4  ;;  %s254_s25 = smov 128   ;;  %s37_s24 = int_to_ptr.vmem [resolvable:$true] %s36_s24 }
   0x9   :  { %s255_s0 = smov 8  }
   0xa   :  { %42 = dma.hbm_to_vmem [thread:$0]  %s35_s22, 256, %s37_s24, [#allocation3], %s254_s25, %s254_s25, %s255_s0  }
   0xb   :  { %243 = dma.done.wait [#allocation5], 32  }
   0xc   :  { %244 = vsyncadd [#allocation5], 4294967264 }
   0xd   :  { %245 = dma.done.wait [#allocation7], 16  }
   0xe   :  { %246 = vsyncadd [#allocation7], 4294967280 }
   0xf   :  { %247 = dma.done.wait [#allocation3], 256  }
  0x10   :  { %248 = vsyncadd [#allocation3], 4294967040 }
  0x11   :  { %55 = sfence }
  0x12   :  { %s71_s1 = sld [smem:[#allocation2]]  ;;  %v56_v0 = vld [vmem:[#allocation8] ss:$4 sm:$0x3]  ;;  %v97_v22 = vlaneseq  ;;  %s256_s7 = smov [#allocation9]  }
  0x13   :  { %s155_s26 = sld [smem:[#allocation2 + $0x1]]  ;;  %v60_v1 = vld [vmem:[#allocation8 + $0x1] ss:$4 sm:$0x3]  ;;  %s138_s8 = sshll.u32 %s256_s7, 4  ;;  %s139_s8 = int_to_ptr.vmem [resolvable:$true] %s138_s8 }
  0x14   :  { %s156_s27 = sld [smem:[#allocation2 + $0x2]]  ;;  %v64_v2 = vld [vmem:[#allocation8 + $0x2] ss:$4 sm:$0x3]  ;;  %vm302_vm0 = vcmp.lt.s32.totalorder %v97_v22, 256  ;;  %s140_s11 = sshll.u32 %s321_s3, 4  ;;  %s141_s11 = int_to_ptr.hbm [resolvable:$true] %s140_s11 }
  0x15   :  { %s157_s2 = sld [smem:[#allocation2 + $0x3]]  ;;  %v58_v3 = vld [vmem:[#allocation8 + $0x8] ss:$4 sm:$0x3]  ;;  %s257_s12 = smov 64  }
  0x16   :  { %s288_s28 = sld [smem:[#allocation6]]  ;;  %v62_v4 = vld [vmem:[#allocation8 + $0x9] ss:$4 sm:$0x3]  ;;  %s258_s13 = smov 4  }
  0x17   :  { %s290_s29 = sld [smem:[#allocation2 + $0x80]]  ;;  %v66_v6 = vld [vmem:[#allocation8 + $0xa] ss:$4 sm:$0x3] }
  0x18   :  { %v72_v5 = vstv %s71_s1  ;;  %s159_s30 = sld [smem:[#allocation2 + $0x81]]  ;;  %v68_v7 = vld [vmem:[#allocation8 + $0x3] ss:$4 sm:$0x3] }
  0x19   :  { %v73_v8 = vmul.f32 %v72_v5, %v56_v0  ;;  %v76_v9 = vstv %s155_s26  ;;  %v74_v10 = vmul.f32 %v72_v5, %v58_v3  ;;  %s292_s4 = sld [smem:[#allocation2 + $0x82]]  ;;  %v70_v13 = vld [vmem:[#allocation8 + $0xb] ss:$4 sm:$0x3] }
  0x1a   :  { %v77_v11 = vmul.f32 %v76_v9, %v60_v1  ;;  %v82_v12 = vstv %s156_s27  ;;  %v78_v14 = vmul.f32 %v76_v9, %v62_v4  ;;  %s294_s5 = sld [smem:[#allocation2 + $0x83]] }
  0x1b   :  { %v83_v15 = vmul.f32 %v82_v12, %v64_v2  ;;  %v88_v16 = vstv %s157_s2  ;;  %v84_v17 = vmul.f32 %v82_v12, %v66_v6  ;;  %s296_s6 = sld [smem:[#allocation6 + $0x1]] }
  0x1c   :  { %v79_v18 = vadd.f32 %v77_v11, %v73_v8  ;;  %v89_v19 = vmul.f32 %v88_v16, %v68_v7  ;;  %v80_v20 = vadd.f32 %v78_v14, %v74_v10  ;;  %v94_v21 = vstv %s288_s28 }
  0x1d   :  { %v90_v23 = vmul.f32 %v88_v16, %v70_v13  ;;  %v105_v24 = vstv %s290_s29 }
  0x1e   :  { %v85_v25 = vadd.f32 %v83_v15, %v79_v18  ;;  %v86_v26 = vadd.f32 %v84_v17, %v80_v20  ;;  %v106_v27 = vmul.f32 %v105_v24, %v56_v0  ;;  %v109_v28 = vstv %s159_s30 }
  0x1f   :  { %v110_v29 = vmul.f32 %v109_v28, %v60_v1  ;;  %v115_v30 = vstv %s292_s4  ;;  %v107_v31 = vmul.f32 %v105_v24, %v58_v3  ;;  %v111_v32 = vmul.f32 %v109_v28, %v62_v4 }
  0x20   :  { %v91_v33 = vadd.f32 %v89_v19, %v85_v25  ;;  %v92_v34 = vadd.f32 %v90_v23, %v86_v26  ;;  %v116_v35 = vmul.f32 %v115_v30, %v64_v2  ;;  %v121_v36 = vstv %s294_s5 }
  0x21   :  { %v112_v38 = vadd.f32 %v110_v29, %v106_v27  ;;  %v122_v39 = vmul.f32 %v121_v36, %v68_v7  ;;  %v113_v40 = vadd.f32 %v111_v32, %v107_v31  ;;  %v117_v43 = vmul.f32 %v115_v30, %v66_v6 }
  0x22   :  { %v95_v41 = vadd.f32 %v94_v21, %v91_v33  ;;  %v96_v42 = vadd.f32 %v94_v21, %v92_v34  ;;  %v123_v44 = vmul.f32 %v121_v36, %v70_v13  ;;  %v127_v46 = vstv %s296_s6 }
  0x23   :  { %v118_v45 = vadd.f32 %v116_v35, %v112_v38  ;;  %v119_v47 = vadd.f32 %v117_v43, %v113_v40 }
  0x24   :  { %101 = vst.msk [vmem:[#allocation9] ss:$2 sm:$0x3] %vm302_vm0, %v95_v41 }
  0x25   :  { %103 = vst.msk [vmem:[#allocation9 + $0x4] ss:$2 sm:$0x3] %vm302_vm0, %v96_v42  ;;  %v124_v48 = vadd.f32 %v122_v39, %v118_v45  ;;  %v125_v49 = vadd.f32 %v123_v44, %v119_v47 }
  0x27   :  { %v128_v50 = vadd.f32 %v127_v46, %v124_v48  ;;  %v129_v51 = vadd.f32 %v127_v46, %v125_v49 }
  0x29   :  { %131 = vst.msk [vmem:[#allocation9 + $0x1] ss:$2 sm:$0x3] %vm302_vm0, %v128_v50 }
  0x2a   :  { %133 = vst.msk [vmem:[#allocation9 + $0x5] ss:$2 sm:$0x3] %vm302_vm0, %v129_v51 }
  0x2b   :  { %146 = dma.vmem_to_hbm [thread:$0]  %s139_s8, 128, %s141_s11, [#allocation4], %s257_s12, %s257_s12, %s258_s13  }
  0x2c   :  { %249 = dma.done.wait [#allocation4], 128  }
  0x2d   :  { %250 = vsyncadd [#allocation4], 4294967168 }
  0x2e   :  { %151 = vsyncpa [#allocation3], 1 }
  0x2f   :  { %152 = vsyncpa [#allocation4], 1 }
  0x30   :  { %153 = vsyncpa [#allocation5], 1 }
  0x31   :  { %154 = vsyncpa [#allocation7], 1 }

</bundles_post_ra>
